<compile_context>
chip_gen: v7x
topology: tpu7x:2x2x1
jax: 0.10.0
libtpu: 0.0.40
codegen_flags: <defaults>
</compile_context>

<pallas_src>
import functools

import jax
import jax.numpy as jnp
from jax import lax
from jax.experimental import pallas as pl
from jax.experimental.pallas import tpu as pltpu


def _mi_fused_kernel(xT_ref, w1_ref, b1_ref, w2_ref, b2_ref, w3_ref, b3_ref,
                     a_ref, *, B, N, T, D):
    BN = B * N
    # --- 1x1 conv stack: ReLU(W2 @ ReLU(W1 @ x + b1) + b2), pixels on lanes ---
    h = jnp.dot(w1_ref[...], xT_ref[...], preferred_element_type=jnp.float32)
    h = jnp.maximum(h + b1_ref[...], 0.0)
    h = jnp.dot(w2_ref[...], h, preferred_element_type=jnp.float32)
    h = jnp.maximum(h + b2_ref[...], 0.0)            # (64, T*B*N), cols = (t, j, u)

    # --- (1, n_hist) conv == sum over t of (D,64)@(64,B*N) ---
    nodesT = jnp.zeros((D, BN), dtype=jnp.float32)
    for t in range(T):                                # static unroll, T is small
        nodesT = nodesT + jnp.dot(w3_ref[t], h[:, t * BN:(t + 1) * BN],
                                  preferred_element_type=jnp.float32)
    nodesT = nodesT + b3_ref[...]                     # (D, B*N), cols = (j, u)
    # TODO(synk): nn.Dropout(inplace=True) on `nodes` -- identity at inference.

    # --- Gram of m = nodes.reshape(N, B*D):  A = sum_j m_j^T @ m_j ---
    acc = jnp.zeros((N, N), dtype=jnp.float32)
    for j in range(B):                                # static unroll, B is small
        mj = nodesT[:, j * N:(j + 1) * N]             # (D, N), K-major
        acc = acc + lax.dot_general(mj, mj, (((0,), (0,)), ((), ())),
                                    preferred_element_type=jnp.float32)
    a_ref[...] = acc


def mi_learner_forward(x, params):
    """x: [B, N, T, H] float32 (T must equal n_hist).  Returns A_mi [N, N]."""
    w1_conv, b1, w2_conv, b2, w3_conv, b3 = params
    B, N, T, H = x.shape
    C = w1_conv.shape[0]                  # 64 hidden channels
    D = w3_conv.shape[0]                  # node_dim
    assert w3_conv.shape[-1] == T, "requires T == n_hist (conv output width 1)"

    # Host-side layout plumbing (tiny XLA transposes, outside the kernel):
    #   xT[h, t*B*N + j*N + u] = x[b, n, t, h]   with   b*N + n = u*B + j
    # so that the kernel's node columns come out already grouped the way the
    # torch-style nodes.reshape(N, -1) needs them for the Gram accumulation.
    xT = x.reshape(N, B, T, H).transpose(3, 2, 1, 0).reshape(H, T * B * N)
    w1 = w1_conv.reshape(C, H)                               # (64, H)   out x in
    w2 = w2_conv.reshape(C, C)                               # (64, 64)
    w3 = jnp.transpose(w3_conv[:, :, 0, :], (2, 0, 1))       # (T, D, 64)
    b1c = b1.reshape(C, 1)
    b2c = b2.reshape(C, 1)
    b3c = b3.reshape(D, 1)

    kernel = functools.partial(_mi_fused_kernel, B=B, N=N, T=T, D=D)
    vmem_spec = pl.BlockSpec(memory_space=pltpu.MemorySpace.VMEM)
    # Whole problem fits comfortably in VMEM, so a single ungridded call keeps
    # h / nodes on-chip and avoids two extra launches + HBM round trips.
    # TODO(synk): tile the pixel axis (grid over M = B*N*T) if the workload
    # grows beyond the VMEM budget (watch v7x's 64 MiB).
    return pl.pallas_call(
        kernel,
        out_shape=jax.ShapeDtypeStruct((N, N), jnp.float32),
        in_specs=[vmem_spec] * 7,
        out_specs=vmem_spec,
        compiler_params=pltpu.CompilerParams(
            vmem_limit_bytes=16 * 1024 * 1024),
    )(xT, w1, b1c, w2, b2c, w3, b3c)


if __name__ == "__main__":
    # MiLearner(n_hist=8, n_in=8, node_dim=32, dropout=0.1); inputs [B, N, T, H]
    B, N, T, H = 2, 16, 8, 8
    C, D = 64, 32

    key = jax.random.PRNGKey(0)
    kx, k1, k2, k3, k4, k5, k6 = jax.random.split(key, 7)
    x = jax.random.normal(kx, (B, N, T, H), jnp.float32)

    # Deterministic weights in PyTorch Conv2d layout (out_ch, in_ch, kh, kw).
    w1_conv = jax.random.normal(k1, (C, H, 1, 1), jnp.float32) / jnp.sqrt(1.0 * H)
    b1 = jax.random.normal(k2, (C,), jnp.float32) * 0.01
    w2_conv = jax.random.normal(k3, (C, C, 1, 1), jnp.float32) / jnp.sqrt(1.0 * C)
    b2 = jax.random.normal(k4, (C,), jnp.float32) * 0.01
    w3_conv = jax.random.normal(k5, (D, C, 1, T), jnp.float32) / jnp.sqrt(1.0 * C * T)
    b3 = jax.random.normal(k6, (D,), jnp.float32) * 0.01
    params = (w1_conv, b1, w2_conv, b2, w3_conv, b3)

    a_mi = jax.jit(lambda xx: mi_learner_forward(xx, params))(x)
    jax.block_until_ready(a_mi)

    # Pure-JAX reference of the same math (validates the fused kernel).
    w1m = w1_conv.reshape(C, H).T
    w2m = w2_conv.reshape(C, C).T
    w3f = w3_conv[:, :, 0, :].transpose(2, 1, 0).reshape(T * C, D)
    h = jnp.maximum(x.reshape(-1, H) @ w1m + b1, 0.0)
    h = jnp.maximum(h @ w2m + b2, 0.0)
    nodes_ref = h.reshape(B * N, T * C) @ w3f + b3
    m_ref = nodes_ref.reshape(N, -1)
    a_ref = m_ref @ m_ref.T

    assert a_mi.shape == (N, N)
    assert jnp.allclose(a_mi, a_ref, rtol=1e-4, atol=1e-3), (
        float(jnp.max(jnp.abs(a_mi - a_ref))))
    print("KERNEL_OK")
</pallas_src>

<mosaic_0001>
module attributes {stable_mosaic.version = 11 : i64} {
  func.func @_mi_fused_kernel(%arg0: memref<8x256xf32, #tpu.memory_space<vmem>>, %arg1: memref<64x8xf32, #tpu.memory_space<vmem>>, %arg2: memref<64x1xf32, #tpu.memory_space<vmem>>, %arg3: memref<64x64xf32, #tpu.memory_space<vmem>>, %arg4: memref<64x1xf32, #tpu.memory_space<vmem>>, %arg5: memref<8x32x64xf32, #tpu.memory_space<vmem>>, %arg6: memref<32x1xf32, #tpu.memory_space<vmem>>, %arg7: memref<16x16xf32, #tpu.memory_space<vmem>>) attributes {dimension_semantics = [], scalar_prefetch = 0 : i64, scratch_operands = 0 : i64, tpu.core_type = #tpu.core_type<tc>} {
    %c0 = arith.constant 0 : index
    %c0_0 = arith.constant 0 : index
    %0 = vector.load %arg1[%c0, %c0_0] : memref<64x8xf32, #tpu.memory_space<vmem>>, vector<64x8xf32>
    %c0_1 = arith.constant 0 : index
    %c0_2 = arith.constant 0 : index
    %1 = vector.load %arg0[%c0_1, %c0_2] : memref<8x256xf32, #tpu.memory_space<vmem>>, vector<8x256xf32>
    %cst = arith.constant dense<0.000000e+00> : vector<64x256xf32>
    %2 = tpu.matmul %0, %1, %cst {dimension_numbers = #tpu.dot_dimension_numbers<[1], [0], [0], [1], [0, 0, 1, 1], [], []>} : vector<64x8xf32>, vector<8x256xf32>, vector<64x256xf32> -> vector<64x256xf32>
    %c0_3 = arith.constant 0 : index
    %c0_4 = arith.constant 0 : index
    %3 = vector.load %arg2[%c0_3, %c0_4] : memref<64x1xf32, #tpu.memory_space<vmem>>, vector<64x1xf32>
    %4 = vector.broadcast %3 : vector<64x1xf32> to vector<64x256xf32>
    %5 = arith.addf %2, %4 : vector<64x256xf32>
    %cst_5 = arith.constant 0.000000e+00 : f32
    %6 = vector.broadcast %cst_5 : f32 to vector<64x256xf32>
    %7 = arith.maximumf %5, %6 : vector<64x256xf32>
    %c0_6 = arith.constant 0 : index
    %c0_7 = arith.constant 0 : index
    %8 = vector.load %arg3[%c0_6, %c0_7] : memref<64x64xf32, #tpu.memory_space<vmem>>, vector<64x64xf32>
    %cst_8 = arith.constant dense<0.000000e+00> : vector<64x256xf32>
    %9 = tpu.matmul %8, %7, %cst_8 {dimension_numbers = #tpu.dot_dimension_numbers<[1], [0], [0], [1], [0, 0, 1, 1], [], []>} : vector<64x64xf32>, vector<64x256xf32>, vector<64x256xf32> -> vector<64x256xf32>
    %c0_9 = arith.constant 0 : index
    %c0_10 = arith.constant 0 : index
    %10 = vector.load %arg4[%c0_9, %c0_10] : memref<64x1xf32, #tpu.memory_space<vmem>>, vector<64x1xf32>
    %11 = vector.broadcast %10 : vector<64x1xf32> to vector<64x256xf32>
    %12 = arith.addf %9, %11 : vector<64x256xf32>
    %cst_11 = arith.constant 0.000000e+00 : f32
    %13 = vector.broadcast %cst_11 : f32 to vector<64x256xf32>
    %14 = arith.maximumf %12, %13 : vector<64x256xf32>
    %cst_12 = arith.constant 0.000000e+00 : f32
    %15 = vector.broadcast %cst_12 : f32 to vector<32x32xf32>
    %c0_13 = arith.constant 0 : index
    %c0_14 = arith.constant 0 : index
    %c0_15 = arith.constant 0 : index
    %16 = vector.load %arg5[%c0_13, %c0_14, %c0_15] : memref<8x32x64xf32, #tpu.memory_space<vmem>>, vector<1x32x64xf32>
    %17 = vector.shape_cast %16 : vector<1x32x64xf32> to vector<32x64xf32>
    %18 = vector.extract_strided_slice %14 {offsets = [0, 0], sizes = [64, 32], strides = [1, 1]} : vector<64x256xf32> to vector<64x32xf32>
    %cst_16 = arith.constant dense<0.000000e+00> : vector<32x32xf32>
    %19 = tpu.matmul %17, %18, %cst_16 {dimension_numbers = #tpu.dot_dimension_numbers<[1], [0], [0], [1], [0, 0, 1, 1], [], []>} : vector<32x64xf32>, vector<64x32xf32>, vector<32x32xf32> -> vector<32x32xf32>
    %20 = arith.addf %15, %19 : vector<32x32xf32>
    %c1 = arith.constant 1 : index
    %c0_17 = arith.constant 0 : index
    %c0_18 = arith.constant 0 : index
    %21 = vector.load %arg5[%c1, %c0_17, %c0_18] : memref<8x32x64xf32, #tpu.memory_space<vmem>>, vector<1x32x64xf32>
    %22 = vector.shape_cast %21 : vector<1x32x64xf32> to vector<32x64xf32>
    %23 = vector.extract_strided_slice %14 {offsets = [0, 32], sizes = [64, 32], strides = [1, 1]} : vector<64x256xf32> to vector<64x32xf32>
    %cst_19 = arith.constant dense<0.000000e+00> : vector<32x32xf32>
    %24 = tpu.matmul %22, %23, %cst_19 {dimension_numbers = #tpu.dot_dimension_numbers<[1], [0], [0], [1], [0, 0, 1, 1], [], []>} : vector<32x64xf32>, vector<64x32xf32>, vector<32x32xf32> -> vector<32x32xf32>
    %25 = arith.addf %20, %24 : vector<32x32xf32>
    %c2 = arith.constant 2 : index
    %c0_20 = arith.constant 0 : index
    %c0_21 = arith.constant 0 : index
    %26 = vector.load %arg5[%c2, %c0_20, %c0_21] : memref<8x32x64xf32, #tpu.memory_space<vmem>>, vector<1x32x64xf32>
    %27 = vector.shape_cast %26 : vector<1x32x64xf32> to vector<32x64xf32>
    %28 = vector.extract_strided_slice %14 {offsets = [0, 64], sizes = [64, 32], strides = [1, 1]} : vector<64x256xf32> to vector<64x32xf32>
    %cst_22 = arith.constant dense<0.000000e+00> : vector<32x32xf32>
    %29 = tpu.matmul %27, %28, %cst_22 {dimension_numbers = #tpu.dot_dimension_numbers<[1], [0], [0], [1], [0, 0, 1, 1], [], []>} : vector<32x64xf32>, vector<64x32xf32>, vector<32x32xf32> -> vector<32x32xf32>
    %30 = arith.addf %25, %29 : vector<32x32xf32>
    %c3 = arith.constant 3 : index
    %c0_23 = arith.constant 0 : index
    %c0_24 = arith.constant 0 : index
    %31 = vector.load %arg5[%c3, %c0_23, %c0_24] : memref<8x32x64xf32, #tpu.memory_space<vmem>>, vector<1x32x64xf32>
    %32 = vector.shape_cast %31 : vector<1x32x64xf32> to vector<32x64xf32>
    %33 = vector.extract_strided_slice %14 {offsets = [0, 96], sizes = [64, 32], strides = [1, 1]} : vector<64x256xf32> to vector<64x32xf32>
    %cst_25 = arith.constant dense<0.000000e+00> : vector<32x32xf32>
    %34 = tpu.matmul %32, %33, %cst_25 {dimension_numbers = #tpu.dot_dimension_numbers<[1], [0], [0], [1], [0, 0, 1, 1], [], []>} : vector<32x64xf32>, vector<64x32xf32>, vector<32x32xf32> -> vector<32x32xf32>
    %35 = arith.addf %30, %34 : vector<32x32xf32>
    %c4 = arith.constant 4 : index
    %c0_26 = arith.constant 0 : index
    %c0_27 = arith.constant 0 : index
    %36 = vector.load %arg5[%c4, %c0_26, %c0_27] : memref<8x32x64xf32, #tpu.memory_space<vmem>>, vector<1x32x64xf32>
    %37 = vector.shape_cast %36 : vector<1x32x64xf32> to vector<32x64xf32>
    %38 = vector.extract_strided_slice %14 {offsets = [0, 128], sizes = [64, 32], strides = [1, 1]} : vector<64x256xf32> to vector<64x32xf32>
    %cst_28 = arith.constant dense<0.000000e+00> : vector<32x32xf32>
    %39 = tpu.matmul %37, %38, %cst_28 {dimension_numbers = #tpu.dot_dimension_numbers<[1], [0], [0], [1], [0, 0, 1, 1], [], []>} : vector<32x64xf32>, vector<64x32xf32>, vector<32x32xf32> -> vector<32x32xf32>
    %40 = arith.addf %35, %39 : vector<32x32xf32>
    %c5 = arith.constant 5 : index
    %c0_29 = arith.constant 0 : index
    %c0_30 = arith.constant 0 : index
    %41 = vector.load %arg5[%c5, %c0_29, %c0_30] : memref<8x32x64xf32, #tpu.memory_space<vmem>>, vector<1x32x64xf32>
    %42 = vector.shape_cast %41 : vector<1x32x64xf32> to vector<32x64xf32>
    %43 = vector.extract_strided_slice %14 {offsets = [0, 160], sizes = [64, 32], strides = [1, 1]} : vector<64x256xf32> to vector<64x32xf32>
    %cst_31 = arith.constant dense<0.000000e+00> : vector<32x32xf32>
    %44 = tpu.matmul %42, %43, %cst_31 {dimension_numbers = #tpu.dot_dimension_numbers<[1], [0], [0], [1], [0, 0, 1, 1], [], []>} : vector<32x64xf32>, vector<64x32xf32>, vector<32x32xf32> -> vector<32x32xf32>
    %45 = arith.addf %40, %44 : vector<32x32xf32>
    %c6 = arith.constant 6 : index
    %c0_32 = arith.constant 0 : index
    %c0_33 = arith.constant 0 : index
    %46 = vector.load %arg5[%c6, %c0_32, %c0_33] : memref<8x32x64xf32, #tpu.memory_space<vmem>>, vector<1x32x64xf32>
    %47 = vector.shape_cast %46 : vector<1x32x64xf32> to vector<32x64xf32>
    %48 = vector.extract_strided_slice %14 {offsets = [0, 192], sizes = [64, 32], strides = [1, 1]} : vector<64x256xf32> to vector<64x32xf32>
    %cst_34 = arith.constant dense<0.000000e+00> : vector<32x32xf32>
    %49 = tpu.matmul %47, %48, %cst_34 {dimension_numbers = #tpu.dot_dimension_numbers<[1], [0], [0], [1], [0, 0, 1, 1], [], []>} : vector<32x64xf32>, vector<64x32xf32>, vector<32x32xf32> -> vector<32x32xf32>
    %50 = arith.addf %45, %49 : vector<32x32xf32>
    %c7 = arith.constant 7 : index
    %c0_35 = arith.constant 0 : index
    %c0_36 = arith.constant 0 : index
    %51 = vector.load %arg5[%c7, %c0_35, %c0_36] : memref<8x32x64xf32, #tpu.memory_space<vmem>>, vector<1x32x64xf32>
    %52 = vector.shape_cast %51 : vector<1x32x64xf32> to vector<32x64xf32>
    %53 = vector.extract_strided_slice %14 {offsets = [0, 224], sizes = [64, 32], strides = [1, 1]} : vector<64x256xf32> to vector<64x32xf32>
    %cst_37 = arith.constant dense<0.000000e+00> : vector<32x32xf32>
    %54 = tpu.matmul %52, %53, %cst_37 {dimension_numbers = #tpu.dot_dimension_numbers<[1], [0], [0], [1], [0, 0, 1, 1], [], []>} : vector<32x64xf32>, vector<64x32xf32>, vector<32x32xf32> -> vector<32x32xf32>
    %55 = arith.addf %50, %54 : vector<32x32xf32>
    %c0_38 = arith.constant 0 : index
    %c0_39 = arith.constant 0 : index
    %56 = vector.load %arg6[%c0_38, %c0_39] : memref<32x1xf32, #tpu.memory_space<vmem>>, vector<32x1xf32>
    %57 = vector.broadcast %56 : vector<32x1xf32> to vector<32x32xf32>
    %58 = arith.addf %55, %57 : vector<32x32xf32>
    %cst_40 = arith.constant 0.000000e+00 : f32
    %59 = vector.broadcast %cst_40 : f32 to vector<16x16xf32>
    %60 = vector.extract_strided_slice %58 {offsets = [0, 0], sizes = [32, 16], strides = [1, 1]} : vector<32x32xf32> to vector<32x16xf32>
    %cst_41 = arith.constant dense<0.000000e+00> : vector<16x16xf32>
    %61 = tpu.matmul %60, %60, %cst_41 {dimension_numbers = #tpu.dot_dimension_numbers<[0], [0], [1], [1], [0, 1, 1, 1], [], []>} : vector<32x16xf32>, vector<32x16xf32>, vector<16x16xf32> -> vector<16x16xf32>
    %62 = arith.addf %59, %61 : vector<16x16xf32>
    %63 = vector.extract_strided_slice %58 {offsets = [0, 16], sizes = [32, 16], strides = [1, 1]} : vector<32x32xf32> to vector<32x16xf32>
    %cst_42 = arith.constant dense<0.000000e+00> : vector<16x16xf32>
    %64 = tpu.matmul %63, %63, %cst_42 {dimension_numbers = #tpu.dot_dimension_numbers<[0], [0], [1], [1], [0, 1, 1, 1], [], []>} : vector<32x16xf32>, vector<32x16xf32>, vector<16x16xf32> -> vector<16x16xf32>
    %65 = arith.addf %62, %64 : vector<16x16xf32>
    %c0_43 = arith.constant 0 : index
    %c0_44 = arith.constant 0 : index
    %66 = vector.load %arg7[%c0_43, %c0_44] : memref<16x16xf32, #tpu.memory_space<vmem>>, vector<16x16xf32>
    tpu.vector_store %arg7[%c0_43, %c0_44], %65 {strides = array<i32>} : memref<16x16xf32, #tpu.memory_space<vmem>>, vector<16x16xf32>,
    return
  }
}

</mosaic_0001>

<bundles_post_ra>
// kernel: _lambda_.1
= control target key start
LH: loop header
LB: loop body
LE: loop exit
PB: predicated region body
PF: predicated region fallthrough
CT: control target
= control target key end

     0   :  { %vm85_vm0 = vcmask 64512   ;;  %v2469_v3 = vmov 0.0   ;;  %v2470_v4 = vmov 0   ;;  %s2875_s0 = inlined_call_operand.vmem [shape: f32[8,256], index: 0, kind: input, shape index: {}]   ;;  %s2876_s1 = inlined_call_operand.vmem [shape: f32[64,8], index: 1, kind: input, shape index: {}]   ;;  %s2877_s2 = inlined_call_operand.vmem [shape: f32[64,1], index: 2, kind: input, shape index: {}]   ;;  %s2878_s3 = inlined_call_operand.vmem [shape: f32[64,64], index: 3, kind: input, shape index: {}]   ;;  %s2879_s4 = inlined_call_operand.vmem [shape: f32[64,1], index: 4, kind: input, shape index: {}]   ;;  %s2880_s5 = inlined_call_operand.vmem [shape: f32[8,32,64], index: 5, kind: input, shape index: {}]   ;;  %s2881_s6 = inlined_call_operand.vmem [shape: f32[32,1], index: 6, kind: input, shape index: {}]   ;;  %s2882_s7 = inlined_call_operand.hbm [shape: f32[16,16], index: 7, kind: output, shape index: {}]  }
   0x1   :  { %v36_v0 = vld [vmem:[%s2875_s0 + $0x8] sm:$0xff]  ;;  %v35_v1 = vld [vmem:[%s2875_s0] sm:$0xff]  ;;  %174 = vmatprep.mubr.f32.mxu1 %v2469_v3  ;;  %2323 = vset.pattern.permute.xlu0 %v2470_v4  ;;  %v39_v7 = vld [vmem:[%s2877_s2 + $0x10] sm:$0xff] }
   0x2   :  { %v27_v2 = vld [vmem:[%s2876_s1] sm:$0xff]  ;;  %110 = vmatprep.subr.mxu1 %v36_v0  ;;  %2324 = vset.pattern.permute.xlu1 %v2470_v4  ;;  %v28_v6 = vld [vmem:[%s2876_s1 + $0x8] sm:$0xff]  ;;  %v40_v9 = vld [vmem:[%s2877_s2 + $0x18] sm:$0xff] }
   0x3   :  { %111 = vmatpush1.msra.mxu1 %v35_v1  ;;  %v37_v5 = vld [vmem:[%s2877_s2] sm:$0xff]  ;;  %v38_v8 = vld [vmem:[%s2877_s2 + $0x8] sm:$0xff]  ;;  %57 = vperm.xlu1 %2324, %v39_v7   ;;  %v29_v10 = vld [vmem:[%s2876_s1 + $0x10] sm:$0xff] }
   0x4   :  { %1738 = vmatmul.mubr.msk.f32.vlgmr.msra.gmra.mrb[0].mxu1 %vm85_vm0, %v27_v2  ;;  %47 = vperm.xlu0 %2323, %v37_v5  }
   0x5   :  { %180 = vmatprep.mubr.f32.mxu1 %v2469_v3 }
   0x8   :  { %1739 = vmatmul.mubr.msk.f32.gmra.mrb[2].mxu1 %vm85_vm0, %v28_v6  ;;  %52 = vperm.xlu0 %2323, %v38_v8  }
   0x9   :  { %186 = vmatprep.mubr.f32.mxu1 %v2469_v3 }
   0xa   :  { %12 = vsyncpa [#allocation3], 0  ;;  %v41_v11 = vld [vmem:[%s2877_s2 + $0x20] sm:$0xff]  ;;  %62 = vperm.xlu1 %2324, %v40_v9   ;;  %v42_v12 = vld [vmem:[%s2877_s2 + $0x28] sm:$0xff]  ;;  %vm295_vm1 = vcmask 523264   ;;  %s2472_s18 = smov 32  }
   0xb   :  { %v30_v13 = vld [vmem:[%s2876_s1 + $0x18] sm:$0xff]  ;;  %v43_v14 = vld [vmem:[%s2877_s2 + $0x30] sm:$0xff]  ;;  %v31_v16 = vld [vmem:[%s2876_s1 + $0x20] sm:$0xff]  ;;  %s2473_s19 = smov 96   ;;  %s2474_s29 = smov 112   ;;  %vm1524_vm2 = vcmask 261120  }
   0xc   :  { %1740 = vmatmul.mubr.msk.f32.gmra.mrb[4].mxu1 %vm85_vm0, %v29_v10  ;;  %67 = vperm.xlu0 %2323, %v41_v11   ;;  %v44_v15 = vld [vmem:[%s2877_s2 + $0x38] sm:$0xff]  ;;  %v247_v17 = vld [vmem:[%s2879_s4] sm:$0xff]  ;;  %v248_v18 = vld [vmem:[%s2879_s4 + $0x8] sm:$0xff]  ;;  %vm1719_vm3 = vcmask 130048  }
   0xd   :  { %192 = vmatprep.mubr.f32.mxu1 %v2469_v3  ;;  %v32_v19 = vld [vmem:[%s2876_s1 + $0x28] sm:$0xff]  ;;  %v249_v20 = vld [vmem:[%s2879_s4 + $0x10] sm:$0xff]  ;;  %v250_v21 = vld [vmem:[%s2879_s4 + $0x18] sm:$0xff] }
   0xe   :  { %72 = vperm.xlu1 %2324, %v42_v12   ;;  %v33_v22 = vld [vmem:[%s2876_s1 + $0x30] sm:$0xff]  ;;  %v251_v23 = vld [vmem:[%s2879_s4 + $0x20] sm:$0xff]  ;;  %v252_v24 = vld [vmem:[%s2879_s4 + $0x28] sm:$0xff] }
   0xf   :  { %v34_v25 = vld [vmem:[%s2876_s1 + $0x38] sm:$0xff]  ;;  %v253_v26 = vld [vmem:[%s2879_s4 + $0x30] sm:$0xff] }
  0x10   :  { %1741 = vmatmul.mubr.msk.f32.gmra.mrb[6].mxu1 %vm85_vm0, %v30_v13  ;;  %77 = vperm.xlu0 %2323, %v43_v14   ;;  %v254_v27 = vld [vmem:[%s2879_s4 + $0x38] sm:$0xff] }
  0x11   :  { %198 = vmatprep.mubr.f32.mxu1 %v2469_v3 }
  0x12   :  { %82 = vperm.xlu1 %2324, %v44_v15  }
  0x14   :  { %1742 = vmatmul.mubr.msk.f32.gmra.mrb[8].mxu1 %vm85_vm0, %v31_v16  ;;  %257 = vperm.xlu0 %2323, %v247_v17  }
  0x15   :  { %204 = vmatprep.mubr.f32.mxu1 %v2469_v3 }
  0x16   :  { %262 = vperm.xlu1 %2324, %v248_v18  }
  0x18   :  { %1743 = vmatmul.mubr.msk.f32.gmra.mrb[10].mxu1 %vm85_vm0, %v32_v19  ;;  %267 = vperm.xlu0 %2323, %v249_v20  }
  0x19   :  { %210 = vmatprep.mubr.f32.mxu1 %v2469_v3 }
  0x1a   :  { %272 = vperm.xlu1 %2324, %v250_v21  }
  0x1c   :  { %1744 = vmatmul.mubr.msk.f32.gmra.mrb[12].mxu1 %vm85_vm0, %v33_v22  ;;  %277 = vperm.xlu0 %2323, %v251_v23  }
  0x1d   :  { %216 = vmatprep.mubr.f32.mxu1 %v2469_v3 }
  0x1e   :  { %282 = vperm.xlu1 %2324, %v252_v24  }
  0x20   :  { %1745 = vmatmul.mubr.msk.f32.gmra.mrb[14].mxu1 %vm85_vm0, %v34_v25  ;;  %287 = vperm.xlu0 %2323, %v253_v26  }
  0x21   :  { %384 = vmatprep.mubr.f32.mxu1 %v2469_v3 }
  0x22   :  { %292 = vperm.xlu1 %2324, %v254_v27  }
  0x82   :  { %v58_v37 = vpop.permute.xlu1 %57 }
  0x83   :  { %v48_v28 = vpop.permute.xlu0 %47 }
  0x87   :  { %v53_v32 = vpop.permute.xlu0 %52 }
  0x89   :  { %v63_v48 = vpop.permute.xlu1 %62 }
  0x8b   :  { %v68_v61 = vpop.permute.xlu0 %67 }
  0x8d   :  { %v73_v0 = vpop.permute.xlu1 %72 }
  0x8f   :  { %v78_v14 = vpop.permute.xlu0 %77 }
  0x91   :  { %v83_v17 = vpop.permute.xlu1 %82 }
  0xd7   :  { %v176_v29 = vpop.f32.mrb[0].mxu1 }
  0xd8   :  { %v178_v30 = vpop.f32.mrb[1].mxu1  ;;  %v177_v31 = vadd.f32 %v176_v29, %v48_v28  ;;  %v239_v29 = vld [vmem:[%s2878_s3] sm:$0xff] }
  0xd9   :  { %v179_v33 = vadd.f32 %v178_v30, %v48_v28  ;;  %v240_v30 = vld [vmem:[%s2878_s3 + $0x8] sm:$0xff] }
  0xda   :  { %v223_v39 = vmax.f32 %v177_v31, 0.0  ;;  %v241_v31 = vld [vmem:[%s2878_s3 + $0x10] sm:$0xff] }
  0xdb   :  { %v182_v34 = vpop.f32.mrb[2].mxu1  ;;  %v224_v41 = vmax.f32 %v179_v33, 0.0  ;;  %v243_v33 = vld [vmem:[%s2878_s3 + $0x20] sm:$0xff] }
  0xdc   :  { %v183_v35 = vadd.f32 %v182_v34, %v53_v32  ;;  %v184_v36 = vpop.f32.mrb[3].mxu1  ;;  %v244_v34 = vld [vmem:[%s2878_s3 + $0x28] sm:$0xff] }
  0xdd   :  { %v185_v38 = vadd.f32 %v184_v36, %v53_v32  ;;  %v242_v32 = vld [vmem:[%s2878_s3 + $0x18] sm:$0xff] }
  0xde   :  { %v225_v40 = vmax.f32 %v183_v35, 0.0  ;;  %v245_v35 = vld [vmem:[%s2878_s3 + $0x30] sm:$0xff]  ;;  %v246_v36 = vld [vmem:[%s2878_s3 + $0x38] sm:$0xff]  ;;  %s2471_s3 = smov 64  }
  0xdf   :  { %v226_v42 = vmax.f32 %v185_v38, 0.0  ;;  %v188_v43 = vpop.f32.mrb[4].mxu1 }
  0xe0   :  { %v2126_v44 = vpack.c.bf16 %v225_v40, %v223_v39  ;;  %v190_v45 = vpop.f32.mrb[5].mxu1  ;;  %v189_v47 = vadd.f32 %v188_v43, %v58_v37  ;;  %v258_v39 = vpop.permute.xlu0 %257 }
  0xe1   :  { %v2124_v46 = vpack.c.bf16 %v226_v42, %v224_v41  ;;  %v191_v49 = vadd.f32 %v190_v45, %v58_v37  ;;  %v263_v41 = vpop.permute.xlu1 %262 }
  0xe2   :  { %v227_v54 = vmax.f32 %v189_v47, 0.0 }
  0xe3   :  { %v194_v50 = vpop.f32.mrb[6].mxu1  ;;  %2125 = vmatprep.subr.bf16.mxu1 %v2124_v46  ;;  %v228_v56 = vmax.f32 %v191_v49, 0.0 }
  0xe4   :  { %v195_v51 = vadd.f32 %v194_v50, %v63_v48  ;;  %v196_v52 = vpop.f32.mrb[7].mxu1  ;;  %2127 = vmatpush1.bf16.msra.mxu1 %v2126_v44 }
  0xe5   :  { %v197_v53 = vadd.f32 %v196_v52, %v63_v48 }
  0xe6   :  { %v229_v55 = vmax.f32 %v195_v51, 0.0 }
  0xe7   :  { %v230_v57 = vmax.f32 %v197_v53, 0.0  ;;  %v200_v58 = vpop.f32.mrb[8].mxu1  ;;  %v268_v53 = vpop.permute.xlu0 %267 }
  0xe8   :  { %v2130_v59 = vpack.c.bf16 %v229_v55, %v227_v54  ;;  %v202_v60 = vpop.f32.mrb[9].mxu1  ;;  %v201_v63 = vadd.f32 %v200_v58, %v68_v61  ;;  %v273_v58 = vpop.permute.xlu1 %272 }
  0xe9   :  { %v2128_v62 = vpack.c.bf16 %v230_v57, %v228_v56  ;;  %v203_v1 = vadd.f32 %v202_v60, %v68_v61 }
  0xea   :  { %v231_v7 = vmax.f32 %v201_v63, 0.0 }
  0xeb   :  { %v206_v2 = vpop.f32.mrb[10].mxu1  ;;  %2129 = vmatprep.subr.bf16.mxu1 %v2128_v62  ;;  %v232_v9 = vmax.f32 %v203_v1, 0.0 }
  0xec   :  { %v207_v4 = vadd.f32 %v206_v2, %v73_v0  ;;  %v208_v5 = vpop.f32.mrb[11].mxu1  ;;  %2131 = vmatpush1.bf16.msra.mxu1 %v2130_v59 }
  0xed   :  { %v209_v6 = vadd.f32 %v208_v5, %v73_v0 }
  0xee   :  { %v233_v8 = vmax.f32 %v207_v4, 0.0 }
  0xef   :  { %v234_v10 = vmax.f32 %v209_v6, 0.0  ;;  %v212_v11 = vpop.f32.mrb[12].mxu1 }
  0xf0   :  { %v2134_v12 = vpack.c.bf16 %v233_v8, %v231_v7  ;;  %v214_v13 = vpop.f32.mrb[13].mxu1  ;;  %v213_v16 = vadd.f32 %v212_v11, %v78_v14  ;;  %v278_v8 = vpop.permute.xlu0 %277 }
  0xf1   :  { %v2132_v15 = vpack.c.bf16 %v234_v10, %v232_v9  ;;  %v215_v18 = vadd.f32 %v214_v13, %v78_v14  ;;  %v283_v13 = vpop.permute.xlu1 %282 }
  0xf2   :  { %v235_v23 = vmax.f32 %v213_v16, 0.0 }
  0xf3   :  { %v218_v19 = vpop.f32.mrb[14].mxu1  ;;  %2133 = vmatprep.subr.bf16.mxu1 %v2132_v15  ;;  %v236_v25 = vmax.f32 %v215_v18, 0.0 }
  0xf4   :  { %v219_v20 = vadd.f32 %v218_v19, %v83_v17  ;;  %v220_v21 = vpop.f32.mrb[15].mxu1  ;;  %2135 = vmatpush1.bf16.msra.mxu1 %v2134_v12 }
  0xf5   :  { %v221_v22 = vadd.f32 %v220_v21, %v83_v17 }
  0xf6   :  { %v237_v24 = vmax.f32 %v219_v20, 0.0 }
  0xf7   :  { %v238_v26 = vmax.f32 %v221_v22, 0.0 }
  0xf8   :  { %v2138_v27 = vpack.c.bf16 %v237_v24, %v235_v23 }
  0xf9   :  { %v2136_v28 = vpack.c.bf16 %v238_v26, %v236_v25  ;;  %v288_v26 = vpop.permute.xlu0 %287 }
  0xfb   :  { %2137 = vmatprep.subr.bf16.mxu1 %v2136_v28 }
  0xfc   :  { %2139 = vmatpush1.bf16.msra.mxu1 %v2138_v27 }
  0xff   :  { %1746 = vmatmul.mubr.msk.f32.vlgmr.msra.gmra.mrb[16].mxu1 %vm295_vm1, %v239_v29 }
 0x100   :  { %390 = vmatprep.mubr.f32.mxu1 %v2469_v3 }
 0x103   :  { %1747 = vmatmul.mubr.msk.f32.gmra.mrb[18].mxu1 %vm295_vm1, %v240_v30 }
 0x104   :  { %396 = vmatprep.mubr.f32.mxu1 %v2469_v3 }
 0x107   :  { %1748 = vmatmul.mubr.msk.f32.gmra.mrb[20].mxu1 %vm295_vm1, %v241_v31  ;;  %v293_v31 = vpop.permute.xlu1 %292 }
 0x108   :  { %402 = vmatprep.mubr.f32.mxu1 %v2469_v3 }
 0x10b   :  { %1749 = vmatmul.mubr.msk.f32.gmra.mrb[22].mxu1 %vm295_vm1, %v242_v32 }
 0x10c   :  { %408 = vmatprep.mubr.f32.mxu1 %v2469_v3 }
 0x10f   :  { %1750 = vmatmul.mubr.msk.f32.gmra.mrb[24].mxu1 %vm295_vm1, %v243_v33 }
 0x110   :  { %414 = vmatprep.mubr.f32.mxu1 %v2469_v3 }
 0x113   :  { %1751 = vmatmul.mubr.msk.f32.gmra.mrb[26].mxu1 %vm295_vm1, %v244_v34 }
 0x114   :  { %420 = vmatprep.mubr.f32.mxu1 %v2469_v3 }
 0x117   :  { %1752 = vmatmul.mubr.msk.f32.gmra.mrb[28].mxu1 %vm295_vm1, %v245_v35 }
 0x118   :  { %426 = vmatprep.mubr.f32.mxu1 %v2469_v3 }
 0x11b   :  { %1753 = vmatmul.mubr.msk.f32.gmra.mrb[30].mxu1 %vm295_vm1, %v246_v36  ;;  %v1766_v36 = vld [vmem:[%s2880_s5 + $0x40] sm:$0xff] }
 0x11c   :  { %1986 = vmatprep.mubr.msk.f32.mxu0 %vm295_vm1, %v1766_v36 }
 0x1d2   :  { %v386_v37 = vpop.f32.mrb[16].mxu1 }
 0x1d3   :  { %v388_v38 = vpop.f32.mrb[17].mxu1  ;;  %v387_v40 = vadd.f32 %v386_v37, %v258_v39 }
 0x1d4   :  { %v389_v42 = vadd.f32 %v388_v38, %v258_v39 }
 0x1d5   :  { %v433_v47 = vmax.f32 %v387_v40, 0.0 }
 0x1d6   :  { %v392_v43 = vpop.f32.mrb[18].mxu1  ;;  %v434_v49 = vmax.f32 %v389_v42, 0.0 }
 0x1d7   :  { %v393_v44 = vadd.f32 %v392_v43, %v263_v41  ;;  %v394_v45 = vpop.f32.mrb[19].mxu1 }
 0x1d8   :  { %v395_v46 = vadd.f32 %v394_v45, %v263_v41 }
 0x1d9   :  { %v435_v48 = vmax.f32 %v393_v44, 0.0 }
 0x1da   :  { %v436_v3 = vmax.f32 %v395_v46, 0.0  ;;  %v398_v50 = vpop.f32.mrb[20].mxu1  ;;  %v1754_v46 = vld [vmem:[%s2880_s5 + $0x20] sm:$0xff] }
 0x1db   :  { %v400_v51 = vpop.f32.mrb[21].mxu1  ;;  %v2652_v52 = vpack.i.bf16 %v435_v48, %v433_v47  ;;  %v399_v55 = vadd.f32 %v398_v50, %v268_v53  ;;  %v2660_v57 = vpack.c.bf16 %v435_v48, %v433_v47  ;;  %1942 = vmatprep.mubr.msk.f32.mxu1 %vm295_vm1, %v1754_v46  ;;  %v1448_v47 = vld [vmem:[%s2881_s6] sm:$0xff]  ;;  %v1450_v48 = vld [vmem:[%s2881_s6 + $0x10] sm:$0xff] }
 0x1dc   :  { %v2654_v54 = vpack.i.bf16 %v436_v3, %v434_v49  ;;  %v2658_v56 = vpack.c.bf16 %v436_v3, %v434_v49  ;;  %v401_v59 = vadd.f32 %v400_v51, %v268_v53  ;;  %v1449_v49 = vld [vmem:[%s2881_s6 + $0x8] sm:$0xff]  ;;  %v1451_v3 = vld [vmem:[%s2881_s6 + $0x18] sm:$0xff] }
 0x1dd   :  { %2326 = vrot.lane.b32.xlu0 %v2652_v52, %s2471_s3  ;;  %v437_v0 = vmax.f32 %v399_v55, 0.0 }
 0x1de   :  { %v404_v60 = vpop.f32.mrb[22].mxu1  ;;  %v438_v2 = vmax.f32 %v401_v59, 0.0 }
 0x1df   :  { %v405_v61 = vadd.f32 %v404_v60, %v273_v58  ;;  %v406_v62 = vpop.f32.mrb[23].mxu1 }
 0x1e0   :  { %v407_v63 = vadd.f32 %v406_v62, %v273_v58 }
 0x1e1   :  { %v439_v1 = vmax.f32 %v405_v61, 0.0 }
 0x1e2   :  { %v440_v4 = vmax.f32 %v407_v63, 0.0  ;;  %v410_v5 = vpop.f32.mrb[24].mxu1 }
 0x1e3   :  { %v412_v6 = vpop.f32.mrb[25].mxu1  ;;  %v2330_v7 = vpack.i.bf16 %v439_v1, %v437_v0  ;;  %v411_v10 = vadd.f32 %v410_v5, %v278_v8  ;;  %v2667_v12 = vpack.c.bf16 %v439_v1, %v437_v0 }
 0x1e4   :  { %v2662_v9 = vpack.i.bf16 %v440_v4, %v438_v2  ;;  %v2665_v11 = vpack.c.bf16 %v440_v4, %v438_v2  ;;  %v413_v14 = vadd.f32 %v412_v6, %v278_v8 }
 0x1e5   :  { %2331 = vrot.lane.b32.xlu1 %v2330_v7, %s2471_s3  ;;  %v441_v19 = vmax.f32 %v411_v10, 0.0 }
 0x1e6   :  { %v416_v15 = vpop.f32.mrb[26].mxu1  ;;  %v442_v21 = vmax.f32 %v413_v14, 0.0 }
 0x1e7   :  { %v417_v16 = vadd.f32 %v416_v15, %v283_v13  ;;  %v418_v17 = vpop.f32.mrb[27].mxu1 }
 0x1e8   :  { %v419_v18 = vadd.f32 %v418_v17, %v283_v13  ;;  %v1768_v17 = vld [vmem:[%s2880_s5 + $0x50] sm:$0xff] }
 0x1e9   :  { %v443_v20 = vmax.f32 %v417_v16, 0.0  ;;  %v1767_v16 = vld [vmem:[%s2880_s5 + $0x48] sm:$0xff] }
 0x1ea   :  { %v444_v22 = vmax.f32 %v419_v18, 0.0  ;;  %v422_v23 = vpop.f32.mrb[28].mxu1 }
 0x1eb   :  { %v424_v24 = vpop.f32.mrb[29].mxu1  ;;  %v2335_v25 = vpack.i.bf16 %v443_v20, %v441_v19  ;;  %v423_v28 = vadd.f32 %v422_v23, %v288_v26  ;;  %v2672_v30 = vpack.c.bf16 %v443_v20, %v441_v19  ;;  %v1769_v23 = vld [vmem:[%s2880_s5 + $0x58] sm:$0xff] }
 0x1ec   :  { %v2375_v27 = vpack.i.bf16 %v444_v22, %v442_v21  ;;  %v2670_v29 = vpack.c.bf16 %v444_v22, %v442_v21  ;;  %v425_v32 = vadd.f32 %v424_v24, %v288_v26  ;;  %v1774_v24 = vld [vmem:[%s2880_s5 + $0x60] sm:$0xff] }
 0x1ed   :  { %2336 = vrot.lane.b32.xlu0 %v2335_v25, %s2471_s3  ;;  %v445_v38 = vmax.f32 %v423_v28, 0.0 }
 0x1ee   :  { %v428_v33 = vpop.f32.mrb[30].mxu1  ;;  %v446_v40 = vmax.f32 %v425_v32, 0.0 }
 0x1ef   :  { %v429_v34 = vadd.f32 %v428_v33, %v293_v31  ;;  %v430_v35 = vpop.f32.mrb[31].mxu1 }
 0x1f0   :  { %v431_v37 = vadd.f32 %v430_v35, %v293_v31 }
 0x1f1   :  { %v447_v39 = vmax.f32 %v429_v34, 0.0  ;;  %2346 = vrot.lane.b32.xlu0 %v2652_v52, %s2472_s18 }
 0x1f2   :  { %v448_v41 = vmax.f32 %v431_v37, 0.0 }
 0x1f3   :  { %v2340_v42 = vpack.i.bf16 %v447_v39, %v445_v38  ;;  %v2680_v43 = vpack.c.bf16 %v447_v39, %v445_v38 }
 0x1f4   :  { %v2385_v44 = vpack.i.bf16 %v448_v41, %v446_v40  ;;  %v2682_v45 = vpack.c.bf16 %v448_v41, %v446_v40 }
 0x1f5   :  { %2341 = vrot.lane.b32.xlu1 %v2340_v42, %s2471_s3  ;;  %2356 = vrot.lane.b32.xlu0 %v2335_v25, %s2472_s18 }
 0x1f9   :  { %2351 = vrot.lane.b32.xlu1 %v2330_v7, %s2472_s18  ;;  %2366 = vrot.lane.b32.xlu0 %v2654_v54, %s2473_s19 }
 0x1fd   :  { %2361 = vrot.lane.b32.xlu1 %v2340_v42, %s2472_s18  ;;  %2376 = vrot.lane.b32.xlu0 %v2375_v27, %s2473_s19 }
 0x201   :  { %2371 = vrot.lane.b32.xlu1 %v2662_v9, %s2473_s19  ;;  %2381 = vrot.lane.b32.xlu0 %v2652_v52, %s2473_s19 }
 0x205   :  { %2386 = vrot.lane.b32.xlu1 %v2385_v44, %s2473_s19  ;;  %2396 = vrot.lane.b32.xlu0 %v2330_v7, %s2473_s19 }
 0x209   :  { %2391 = vrot.lane.b32.xlu1 %v2654_v54, %s2471_s3  ;;  %2406 = vrot.lane.b32.xlu0 %v2335_v25, %s2473_s19 }
 0x20d   :  { %2401 = vrot.lane.b32.xlu1 %v2662_v9, %s2471_s3  ;;  %2416 = vrot.lane.b32.xlu0 %v2340_v42, %s2473_s19  ;;  %v1775_v42 = vld [vmem:[%s2880_s5 + $0x68] sm:$0xff] }
 0x211   :  { %2411 = vrot.lane.b32.xlu1 %v2375_v27, %s2471_s3  ;;  %2426 = vrot.lane.b32.xlu0 %v2654_v54, %s2472_s18 }
 0x215   :  { %2421 = vrot.lane.b32.xlu1 %v2385_v44, %s2471_s3  ;;  %2436 = vrot.lane.b32.xlu0 %v2375_v27, %s2472_s18 }
 0x219   :  { %2431 = vrot.lane.b32.xlu1 %v2662_v9, %s2472_s18  ;;  %1454 = vperm.xlu0 %2323, %v1448_v47   ;;  %v1776_v47 = vld [vmem:[%s2880_s5 + $0x70] sm:$0xff] }
 0x21d   :  { %2441 = vrot.lane.b32.xlu1 %v2385_v44, %s2472_s18  ;;  %1464 = vperm.xlu0 %2323, %v1450_v48  }
 0x221   :  { %1459 = vperm.xlu1 %2324, %v1449_v49  }
 0x225   :  { %1469 = vperm.xlu1 %2324, %v1451_v3   ;;  %v1777_v3 = vld [vmem:[%s2880_s5 + $0x78] sm:$0xff] }
 0x24f   :  { %v2327_v50 = vpop.permute.xlu0 %2326 }
 0x250   :  { %v2329_v51 = vunpack.i.h.bf16 %v2327_v50  ;;  %v2328_v52 = vunpack.i.l.bf16 %v2327_v50 }
 0x252   :  { %v2172_v53 = vpack.c.bf16 %v2329_v51, %v2328_v52  ;;  %v1782_v52 = vld [vmem:[%s2880_s5 + $0x80] sm:$0xff] }
 0x254   :  { %2173 = vmatprep.subr.bf16.mxu0 %v2172_v53 }
 0x255   :  { %2175 = vmatpush3.bf16.msra.mxu0 %v2172_v53 }
 0x257   :  { %v2332_v54 = vpop.permute.xlu1 %2331 }
 0x258   :  { %v2334_v55 = vunpack.i.h.bf16 %v2332_v54  ;;  %v2333_v58 = vunpack.i.l.bf16 %v2332_v54 }
 0x25a   :  { %v2176_v59 = vpack.c.bf16 %v2334_v55, %v2333_v58  ;;  %v1757_v58 = vld [vmem:[%s2880_s5 + $0x38] sm:$0xff] }
 0x25c   :  { %2177 = vmatprep.subr.bf16.mxu0 %v2176_v59 }
 0x25d   :  { %2179 = vmatpush3.bf16.msra.mxu0 %v2176_v59 }
 0x25f   :  { %v2337_v60 = vpop.permute.xlu0 %2336 }
 0x260   :  { %v2339_v61 = vunpack.i.h.bf16 %v2337_v60  ;;  %v2338_v62 = vunpack.i.l.bf16 %v2337_v60 }
 0x262   :  { %v2180_v63 = vpack.c.bf16 %v2339_v61, %v2338_v62 }
 0x263   :  { %v2347_v0 = vpop.permute.xlu0 %2346 }
 0x264   :  { %2181 = vmatprep.subr.bf16.mxu0 %v2180_v63  ;;  %v2349_v4 = vunpack.i.h.bf16 %v2347_v0  ;;  %v2348_v5 = vunpack.i.l.bf16 %v2347_v0 }
 0x265   :  { %2183 = vmatpush3.bf16.msra.mxu0 %v2180_v63 }
 0x266   :  { %v2188_v13 = vpack.c.bf16 %v2349_v4, %v2348_v5 }
 0x267   :  { %v2342_v1 = vpop.permute.xlu1 %2341  ;;  %v2357_v2 = vpop.permute.xlu0 %2356 }
 0x268   :  { %v2344_v6 = vunpack.i.h.bf16 %v2342_v1  ;;  %v2343_v7 = vunpack.i.l.bf16 %v2342_v1  ;;  %v2359_v18 = vunpack.i.h.bf16 %v2357_v2  ;;  %v2358_v19 = vunpack.i.l.bf16 %v2357_v2  ;;  %v1790_v2 = vld [vmem:[%s2880_s5 + $0xa0] sm:$0xff] }
 0x26a   :  { %v2184_v8 = vpack.c.bf16 %v2344_v6, %v2343_v7  ;;  %v2196_v25 = vpack.c.bf16 %v2359_v18, %v2358_v19  ;;  %v450_v7 = vld [vmem:[%s2880_s5 + $0x8] sm:$0xff]  ;;  %v1792_v19 = vld [vmem:[%s2880_s5 + $0xb0] sm:$0xff] }
 0x26b   :  { %v2352_v9 = vpop.permute.xlu1 %2351  ;;  %v2719_v10 = vpop.permute.xlu0 %2366  ;;  %v1791_v18 = vld [vmem:[%s2880_s5 + $0xa8] sm:$0xff] }
 0x26c   :  { %v2354_v14 = vunpack.i.h.bf16 %v2352_v9  ;;  %v2353_v15 = vunpack.i.l.bf16 %v2352_v9  ;;  %2185 = vmatprep.subr.bf16.mxu0 %v2184_v8  ;;  %v2369_v53 = vunpack.i.h.bf16 %v2719_v10  ;;  %v2368_v54 = vunpack.i.l.bf16 %v2719_v10 }
 0x26d   :  { %2187 = vmatpush3.bf16.msra.mxu0 %v2184_v8  ;;  %v451_v8 = vld [vmem:[%s2880_s5 + $0x10] sm:$0xff] }
 0x26e   :  { %2189 = vmatprep.subr.bf16.mxu0 %v2188_v13  ;;  %v2192_v21 = vpack.c.bf16 %v2354_v14, %v2353_v15  ;;  %v2220_v59 = vpack.c.bf16 %v2369_v53, %v2368_v54  ;;  %v1808_v53 = vld [vmem:[%s2880_s5 + $0xf0] sm:$0xff]  ;;  %v1809_v54 = vld [vmem:[%s2880_s5 + $0xf8] sm:$0xff] }
 0x26f   :  { %v2727_v20 = vpop.permute.xlu0 %2376  ;;  %v2362_v22 = vpop.permute.xlu1 %2361 }
 0x270   :  { %1987 = vmatmul.mubr.msk.f32.vlgmr.msra.gmra.mrb[0].mxu0 %vm295_vm1, %v1767_v16  ;;  %v2364_v27 = vunpack.i.h.bf16 %v2362_v22  ;;  %v2363_v28 = vunpack.i.l.bf16 %v2362_v22  ;;  %v2379_v63 = vunpack.i.h.bf16 %v2727_v20  ;;  %v2378_v0 = vunpack.i.l.bf16 %v2727_v20 }
 0x271   :  { %2191 = vmatpush3.bf16.msra.mxu0 %v2188_v13  ;;  %1989 = vmatprep.mubr.msk.f32.mxu0 %vm295_vm1, %v1768_v17 }
 0x272   :  { %2193 = vmatprep.subr.bf16.mxu0 %v2192_v21  ;;  %v2200_v35 = vpack.c.bf16 %v2364_v27, %v2363_v28  ;;  %v2228_v4 = vpack.c.bf16 %v2379_v63, %v2378_v0 }
 0x273   :  { %v2382_v26 = vpop.permute.xlu0 %2381  ;;  %v2372_v51 = vpop.permute.xlu1 %2371 }
 0x274   :  { %v2384_v31 = vunpack.i.h.bf16 %v2382_v26  ;;  %v2383_v32 = vunpack.i.l.bf16 %v2382_v26  ;;  %1990 = vmatmul.mubr.msk.f32.gmra.mrb[2].mxu0 %vm295_vm1, %v1769_v23  ;;  %v2374_v60 = vunpack.i.h.bf16 %v2372_v51  ;;  %v2373_v61 = vunpack.i.l.bf16 %v2372_v51 }
 0x275   :  { %2195 = vmatpush3.bf16.msra.mxu0 %v2192_v21  ;;  %2008 = vmatprep.mubr.msk.f32.mxu0 %vm295_vm1, %v1774_v24  ;;  %v1793_v24 = vld [vmem:[%s2880_s5 + $0xb8] sm:$0xff] }
 0x276   :  { %v2140_v33 = vpack.c.bf16 %v2384_v31, %v2383_v32  ;;  %2197 = vmatprep.subr.bf16.mxu0 %v2196_v25  ;;  %v2224_v1 = vpack.c.bf16 %v2374_v60, %v2373_v61 }
 0x277   :  { %v2397_v34 = vpop.permute.xlu0 %2396  ;;  %v2387_v55 = vpop.permute.xlu1 %2386 }
 0x278   :  { %v2399_v36 = vunpack.i.h.bf16 %v2397_v34  ;;  %v2398_v37 = vunpack.i.l.bf16 %v2397_v34  ;;  %2141 = vmatprep.subr.bf16.mxu1 %v2140_v33  ;;  %v2389_v5 = vunpack.i.h.bf16 %v2387_v55  ;;  %v2388_v6 = vunpack.i.l.bf16 %v2387_v55 }
 0x279   :  { %2143 = vmatpush3.bf16.msra.mxu1 %v2140_v33  ;;  %2199 = vmatpush3.bf16.msra.mxu0 %v2196_v25  ;;  %v1798_v25 = vld [vmem:[%s2880_s5 + $0xc0] sm:$0xff] }
 0x27a   :  { %v2144_v38 = vpack.c.bf16 %v2399_v36, %v2398_v37  ;;  %2201 = vmatprep.subr.bf16.mxu0 %v2200_v35  ;;  %v2232_v9 = vpack.c.bf16 %v2389_v5, %v2388_v6 }
 0x27b   :  { %v2407_v39 = vpop.permute.xlu0 %2406  ;;  %v2392_v62 = vpop.permute.xlu1 %2391 }
 0x27c   :  { %v2409_v40 = vunpack.i.h.bf16 %v2407_v39  ;;  %v2408_v41 = vunpack.i.l.bf16 %v2407_v39  ;;  %2145 = vmatprep.subr.bf16.mxu1 %v2144_v38  ;;  %v2394_v10 = vunpack.i.h.bf16 %v2392_v62  ;;  %v2393_v13 = vunpack.i.l.bf16 %v2392_v62 }
 0x27d   :  { %2147 = vmatpush3.bf16.msra.mxu1 %v2144_v38  ;;  %2203 = vmatpush3.bf16.msra.mxu0 %v2200_v35 }
 0x27e   :  { %v2148_v44 = vpack.c.bf16 %v2409_v40, %v2408_v41  ;;  %2205 = vmatprep.subr.bf16.mxu0 %v2658_v56  ;;  %v2236_v15 = vpack.c.bf16 %v2394_v10, %v2393_v13  ;;  %v1799_v40 = vld [vmem:[%s2880_s5 + $0xc8] sm:$0xff]  ;;  %v1800_v41 = vld [vmem:[%s2880_s5 + $0xd0] sm:$0xff] }
 0x27f   :  { %v2417_v46 = vpop.permute.xlu0 %2416 }
 0x280   :  { %v2419_v48 = vunpack.i.h.bf16 %v2417_v46  ;;  %v2418_v49 = vunpack.i.l.bf16 %v2417_v46  ;;  %2149 = vmatprep.subr.bf16.mxu1 %v2148_v44  ;;  %2009 = vmatmul.mubr.msk.f32.vlgmr.msra.gmra.mrb[0].mxu0 %vm295_vm1, %v1775_v42 }
 0x281   :  { %2151 = vmatpush3.bf16.msra.mxu1 %v2148_v44  ;;  %2207 = vmatpush3.bf16.msra.mxu0 %v2658_v56  ;;  %v1755_v56 = vld [vmem:[%s2880_s5 + $0x28] sm:$0xff] }
 0x282   :  { %v2152_v50 = vpack.c.bf16 %v2419_v48, %v2418_v49  ;;  %2209 = vmatprep.subr.bf16.mxu0 %v2665_v11  ;;  %2011 = vmatprep.mubr.msk.f32.mxu0 %vm295_vm1, %v1776_v47  ;;  %v1801_v48 = vld [vmem:[%s2880_s5 + $0xd8] sm:$0xff]  ;;  %v1806_v49 = vld [vmem:[%s2880_s5 + $0xe0] sm:$0xff] }
 0x283   :  { %v2427_v31 = vpop.permute.xlu0 %2426 }
 0x284   :  { %2153 = vmatprep.subr.bf16.mxu1 %v2152_v50  ;;  %2012 = vmatmul.mubr.msk.f32.gmra.mrb[2].mxu0 %vm295_vm1, %v1777_v3  ;;  %v2429_v32 = vunpack.i.h.bf16 %v2427_v31  ;;  %v2428_v33 = vunpack.i.l.bf16 %v2427_v31 }
 0x285   :  { %2155 = vmatpush3.bf16.msra.mxu1 %v2152_v50  ;;  %2211 = vmatpush3.bf16.msra.mxu0 %v2665_v11  ;;  %v1756_v11 = vld [vmem:[%s2880_s5 + $0x30] sm:$0xff] }
 0x286   :  { %2157 = vmatprep.subr.bf16.mxu1 %v2660_v57  ;;  %2213 = vmatprep.subr.bf16.mxu0 %v2670_v29  ;;  %v2252_v36 = vpack.c.bf16 %v2429_v32, %v2428_v33 }
 0x287   :  { %2030 = vmatprep.mubr.msk.f32.mxu0 %vm295_vm1, %v1782_v52  ;;  %v2437_v39 = vpop.permute.xlu0 %2436 }
 0x288   :  { %1943 = vmatmul.mubr.msk.f32.vlgmr.msra.gmra.mrb[32].mxu1 %vm295_vm1, %v1755_v56  ;;  %v2439_v42 = vunpack.i.h.bf16 %v2437_v39  ;;  %v2438_v44 = vunpack.i.l.bf16 %v2437_v39  ;;  %v1807_v56 = vld [vmem:[%s2880_s5 + $0xe8] sm:$0xff] }
 0x289   :  { %2159 = vmatpush3.bf16.msra.mxu1 %v2660_v57  ;;  %2215 = vmatpush3.bf16.msra.mxu0 %v2670_v29  ;;  %v449_v57 = vld [vmem:[%s2880_s5] sm:$0xff]  ;;  %v1783_v29 = vld [vmem:[%s2880_s5 + $0x88] sm:$0xff] }
 0x28a   :  { %2161 = vmatprep.subr.bf16.mxu1 %v2667_v12  ;;  %2217 = vmatprep.subr.bf16.mxu0 %v2682_v45  ;;  %v2260_v3 = vpack.c.bf16 %v2439_v42, %v2438_v44 }
 0x28b   :  { %1945 = vmatprep.mubr.msk.f32.mxu1 %vm295_vm1, %v1756_v11 }
 0x28c   :  { %1946 = vmatmul.mubr.msk.f32.gmra.mrb[34].mxu1 %vm295_vm1, %v1757_v58 }
 0x28d   :  { %2163 = vmatpush3.bf16.msra.mxu1 %v2667_v12  ;;  %2219 = vmatpush3.bf16.msra.mxu0 %v2682_v45  ;;  %v1784_v12 = vld [vmem:[%s2880_s5 + $0x90] sm:$0xff]  ;;  %v1785_v45 = vld [vmem:[%s2880_s5 + $0x98] sm:$0xff] }
 0x28e   :  { %2165 = vmatprep.subr.bf16.mxu1 %v2672_v30  ;;  %2221 = vmatprep.subr.bf16.mxu0 %v2220_v59 }
 0x28f   :  { %1964 = vmatprep.mubr.msk.f32.mxu1 %vm295_vm1, %v449_v57 }
 0x290   :  { %2031 = vmatmul.mubr.msk.f32.vlgmr.msra.gmra.mrb[0].mxu0 %vm295_vm1, %v1783_v29 }
 0x291   :  { %2167 = vmatpush3.bf16.msra.mxu1 %v2672_v30  ;;  %2223 = vmatpush3.bf16.msra.mxu0 %v2220_v59  ;;  %v2402_v30 = vpop.permute.xlu1 %2401 }
 0x292   :  { %2169 = vmatprep.subr.bf16.mxu1 %v2680_v43  ;;  %2225 = vmatprep.subr.bf16.mxu0 %v2224_v1  ;;  %v2404_v16 = vunpack.i.h.bf16 %v2402_v30  ;;  %v2403_v17 = vunpack.i.l.bf16 %v2402_v30 }
 0x293   :  { %2033 = vmatprep.mubr.msk.f32.mxu0 %vm295_vm1, %v1784_v12 }
 0x294   :  { %2034 = vmatmul.mubr.msk.f32.gmra.mrb[2].mxu0 %vm295_vm1, %v1785_v45  ;;  %v2240_v20 = vpack.c.bf16 %v2404_v16, %v2403_v17 }
 0x295   :  { %2171 = vmatpush3.bf16.msra.mxu1 %v2680_v43  ;;  %2227 = vmatpush3.bf16.msra.mxu0 %v2224_v1  ;;  %v452_v43 = vld [vmem:[%s2880_s5 + $0x18] sm:$0xff]  ;;  %v2412_v14 = vpop.permute.xlu1 %2411  ;;  %s2475_s5 = smov [#allocation2]  }
 0x296   :  { %2229 = vmatprep.subr.bf16.mxu0 %v2228_v4  ;;  %2052 = vmatprep.mubr.msk.f32.mxu0 %vm295_vm1, %v1790_v2  ;;  %v2414_v21 = vunpack.i.h.bf16 %v2412_v14  ;;  %v2413_v22 = vunpack.i.l.bf16 %v2412_v14  ;;  %s1727_s30 = sshll.u32 %s2475_s5, 4  ;;  %s1728_s30 = int_to_ptr.vmem [resolvable:$true] %s1727_s30 }
 0x297   :  { %s2445_s8 = scalar_lea.vmem %s1728_s30, 256  ;;  %p2450_p1 = scmp.lt.s32.totalorder %s1728_s30, %s1728_s30 }
 0x298   :  { %1965 = vmatmul.mubr.msk.f32.vlgmr.msra.gmra.mrb[32].mxu1 %vm295_vm1, %v450_v7  ;;  %v2244_v26 = vpack.c.bf16 %v2414_v21, %v2413_v22  ;;  %v1455_v57 = vpop.permute.xlu0 %1454  ;;  %p2446_p0 = scmp.ne.s32.totalorder %s1728_s30, %s2445_s8  ;;  %p2451_p2 = scmp.lt.s32.totalorder %s2445_s8, %s2445_s8 }
 0x299   :  { %2231 = vmatpush3.bf16.msra.mxu0 %v2228_v4  ;;  %1967 = vmatprep.mubr.msk.f32.mxu1 %vm295_vm1, %v451_v8  ;;  %v2422_v23 = vpop.permute.xlu1 %2421 }
 0x29a   :  { %2233 = vmatprep.subr.bf16.mxu0 %v2232_v9  ;;  %v2424_v27 = vunpack.i.h.bf16 %v2422_v23  ;;  %v2423_v28 = vunpack.i.l.bf16 %v2422_v23  ;;  %p2452_p3 = por %p2451_p2, %p2450_p1 }
 0x29c   :  { %1968 = vmatmul.mubr.msk.f32.gmra.mrb[34].mxu1 %vm295_vm1, %v452_v43  ;;  %v2248_v34 = vpack.c.bf16 %v2424_v27, %v2423_v28  ;;  %v1465_v30 = vpop.permute.xlu0 %1464  ;;  %p2453_p4 = pnand %p2452_p3, %p2446_p0 }
 0x29d   :  { %2235 = vmatpush3.bf16.msra.mxu0 %v2232_v9  ;;  %v2432_v35 = vpop.permute.xlu1 %2431 }
 0x29e   :  { %2237 = vmatprep.subr.bf16.mxu0 %v2236_v15  ;;  %v2434_v37 = vunpack.i.h.bf16 %v2432_v35  ;;  %v2433_v38 = vunpack.i.l.bf16 %v2432_v35 }
 0x2a0   :  { %2053 = vmatmul.mubr.msk.f32.vlgmr.msra.gmra.mrb[0].mxu0 %vm295_vm1, %v1791_v18  ;;  %v2256_v46 = vpack.c.bf16 %v2434_v37, %v2433_v38 }
 0x2a1   :  { %2239 = vmatpush3.bf16.msra.mxu0 %v2236_v15  ;;  %2055 = vmatprep.mubr.msk.f32.mxu0 %vm295_vm1, %v1792_v19  ;;  %v2442_v47 = vpop.permute.xlu1 %2441 }
 0x2a2   :  { %2241 = vmatprep.subr.bf16.mxu0 %v2240_v20  ;;  %v2444_v50 = vunpack.i.h.bf16 %v2442_v47  ;;  %v2443_v51 = vunpack.i.l.bf16 %v2442_v47 }
 0x2a4   :  { %2056 = vmatmul.mubr.msk.f32.gmra.mrb[2].mxu0 %vm295_vm1, %v1793_v24  ;;  %v2264_v52 = vpack.c.bf16 %v2444_v50, %v2443_v51 }
 0x2a5   :  { %2243 = vmatpush3.bf16.msra.mxu0 %v2240_v20  ;;  %2074 = vmatprep.mubr.msk.f32.mxu0 %vm295_vm1, %v1798_v25  ;;  %v1460_v60 = vpop.permute.xlu1 %1459 }
 0x2a6   :  { %2245 = vmatprep.subr.bf16.mxu0 %v2244_v26 }
 0x2a9   :  { %2247 = vmatpush3.bf16.msra.mxu0 %v2244_v26  ;;  %v1470_v4 = vpop.permute.xlu1 %1469 }
 0x2aa   :  { %2249 = vmatprep.subr.bf16.mxu0 %v2248_v34 }
 0x2ad   :  { %2251 = vmatpush3.bf16.msra.mxu0 %v2248_v34 }
 0x2ae   :  { %2253 = vmatprep.subr.bf16.mxu0 %v2252_v36 }
 0x2b0   :  { %2075 = vmatmul.mubr.msk.f32.vlgmr.msra.gmra.mrb[0].mxu0 %vm295_vm1, %v1799_v40 }
 0x2b1   :  { %2255 = vmatpush3.bf16.msra.mxu0 %v2252_v36  ;;  %2077 = vmatprep.mubr.msk.f32.mxu0 %vm295_vm1, %v1800_v41 }
 0x2b2   :  { %2257 = vmatprep.subr.bf16.mxu0 %v2256_v46 }
 0x2b4   :  { %2078 = vmatmul.mubr.msk.f32.gmra.mrb[2].mxu0 %vm295_vm1, %v1801_v48 }
 0x2b5   :  { %2259 = vmatpush3.bf16.msra.mxu0 %v2256_v46  ;;  %2096 = vmatprep.mubr.msk.f32.mxu0 %vm295_vm1, %v1806_v49 }
 0x2b6   :  { %2261 = vmatprep.subr.bf16.mxu0 %v2260_v3 }
 0x2b9   :  { %2263 = vmatpush3.bf16.msra.mxu0 %v2260_v3 }
 0x2ba   :  { %2265 = vmatprep.subr.bf16.mxu0 %v2264_v52 }
 0x2bd   :  { %2267 = vmatpush3.bf16.msra.mxu0 %v2264_v52 }
 0x2c0   :  { %2097 = vmatmul.mubr.msk.f32.vlgmr.msra.gmra.mrb[0].mxu0 %vm295_vm1, %v1807_v56 }
 0x2c1   :  { %2099 = vmatprep.mubr.msk.f32.mxu0 %vm295_vm1, %v1808_v53 }
 0x2c4   :  { %2100 = vmatmul.mubr.msk.f32.gmra.mrb[2].mxu0 %vm295_vm1, %v1809_v54 }
 0x36b   :  { %v1966_v11 = vpop.f32.mrb[32].mxu1 }
 0x36c   :  { %v665_v55 = vpop.f32.mrb[33].mxu1 }
 0x36f   :  { %v1969_v58 = vpop.f32.mrb[34].mxu1 }
 0x370   :  { %v675_v59 = vpop.f32.mrb[35].mxu1 }
 0x393   :  { %v2098_v61 = vpop.f32.mrb[0].mxu0 }
 0x394   :  { %v2284_v29 = vadd.f32 %v2098_v61, %v1966_v11  ;;  %v1425_v62 = vpop.f32.mrb[1].mxu0 }
 0x395   :  { %v2285_v63 = vadd.f32 %v1425_v62, %v665_v55 }
 0x396   :  { %v1473_v0 = vadd.f32 %v2284_v29, %v1460_v60 }
 0x397   :  { %v1472_v1 = vadd.f32 %v2285_v63, %v1455_v57  ;;  %v2101_v12 = vpop.f32.mrb[2].mxu0 }
 0x398   :  { %v2286_v45 = vadd.f32 %v2101_v12, %v1969_v58  ;;  %v1435_v2 = vpop.f32.mrb[3].mxu0  ;;  %1482 = vrot.lane.b32.xlu1 %v1473_v0, %s2474_s29 }
 0x399   :  { %v2287_v5 = vadd.f32 %v1435_v2, %v675_v59  ;;  %1480 = vrot.lane.b32.xlu0 %v1472_v1, %s2474_s29  ;;  %v2276_v6 = vpack.c.bf16 %v1473_v0, %v1472_v1 }
 0x39a   :  { %v1475_v7 = vadd.f32 %v2286_v45, %v1470_v4 }
 0x39b   :  { %v1474_v8 = vadd.f32 %v2287_v5, %v1465_v30 }
 0x39c   :  { %1486 = vrot.lane.b32.xlu1 %v1475_v7, %s2474_s29 }
 0x39d   :  { %1484 = vrot.lane.b32.xlu0 %v1474_v8, %s2474_s29  ;;  %v2280_v9 = vpack.c.bf16 %v1475_v7, %v1474_v8 }
 0x3c5   :  { %1606 = vxpose.xlu1.b32.start [1/4] (short) (narrow) %v1472_v1, 16 }
 0x3c9   :  { %1607 = vxpose.xlu1.b32.cont [2/4] (short) (narrow) %v1473_v0, 16 }
 0x3cd   :  { %1608 = vxpose.xlu1.b32.cont [3/4] (short) (narrow) %v1474_v8, 16 }
 0x3d1   :  { %1609 = vxpose.xlu1.b32.end [4/4] (short) (narrow) %v1475_v7, 16 }
 0x40a   :  { %v1483_v10 = vpop.permute.xlu1 %1482 }
 0x40b   :  { %v1481_v13 = vpop.permute.xlu0 %1480 }
 0x40c   :  { %v2268_v43 = vpack.c.bf16 %v1483_v10, %v1481_v13  ;;  %1492 = vxpose.xlu0.b32.start [1/4] (short) (narrow) %v1481_v13, 16 }
 0x40e   :  { %2269 = vmatprep.subr.bf16.mxu1 %v2268_v43  ;;  %v1487_v14 = vpop.permute.xlu1 %1486 }
 0x40f   :  { %2271 = vmatpush3.bf16.msra.mxu1 %v2268_v43  ;;  %v1485_v15 = vpop.permute.xlu0 %1484 }
 0x410   :  { %v2272_v16 = vpack.c.bf16 %v1487_v14, %v1485_v15  ;;  %1493 = vxpose.xlu0.b32.cont [2/4] (short) (narrow) %v1483_v10, 16 }
 0x412   :  { %2273 = vmatprep.subr.bf16.mxu1 %v2272_v16 }
 0x413   :  { %2275 = vmatpush3.bf16.msra.mxu1 %v2272_v16 }
 0x414   :  { %2277 = vmatprep.subr.bf16.mxu1 %v2276_v6  ;;  %1494 = vxpose.xlu0.b32.cont [3/4] (short) (narrow) %v1485_v15, 16 }
 0x418   :  { %1495 = vxpose.xlu0.b32.end [4/4] (short) (narrow) %v1487_v14, 16 }
 0x445   :  { %v1622_v18 = vpop.trf.xlu1 }
 0x449   :  { %v1623_v20 = vpop.trf.xlu1 }
 0x48c   :  { %v1508_v17 = vpop.trf.xlu0 }
 0x48d   :  { %2110 = vmatprep.mubr.msk.f32.mxu1 %vm1524_vm2, %v1508_v17 }
 0x490   :  { %v1509_v19 = vpop.trf.xlu0 }
 0x491   :  { %2111 = vmatmul.mubr.msk.f32.vlgmr.msra.gmra.mrb[36].mxu1 %vm1524_vm2, %v1509_v19 }
 0x492   :  { %2279 = vmatpush3.bf16.msra.mxu1 %v2276_v6  ;;  %2121 = vmatprep.mubr.msk.f32.mxu1 %vm1524_vm2, %v1622_v18 }
 0x493   :  { %2281 = vmatprep.subr.bf16.mxu1 %v2280_v9 }
 0x496   :  { %2283 = vmatpush3.bf16.msra.mxu1 %v2280_v9 }
 0x499   :  { %2122 = vmatmul.mubr.msk.f32.vlgmr.msra.gmra.mrb[36].mxu1 %vm1524_vm2, %v1623_v20 }
 0x56c   :  { %v2123_v21 = vpop.f32.mrb[36].mxu1 }
 0x56d   :  { %1721 = vst.msk [vmem:[#allocation2 + $0x8] sm:$0xff] %vm1719_vm3, %v2123_v21  ;;  %v1710_v22 = vpop.f32.mrb[37].mxu1 }
 0x56e   :  { %1720 = vst.msk [vmem:[#allocation2] sm:$0xff] %vm1719_vm3, %v1710_v22 }
 0x56f   :  { %2456 = shalt.err (!%p2453_p4)
}
 0x570   :  { %s2457_s2 = scalar_lea.hbm %s2882_s7, 256 }
 0x571   :  { %p2458_p5 = scmp.ne.s32.totalorder %s2882_s7, %s2457_s2  ;;  %p2461_p6 = scmp.lt.u32.totalorder %s2457_s2, %s2882_s7 }
 0x573   :  { %p2463_p7 = pnand %p2461_p6, %p2458_p5 }
 0x575   :  { %2466 = shalt.err (!%p2463_p7)
}
 0x576   :  { %s2476_s14 = smov 128   ;;  %s2477_s15 = smov 8  }
 0x577   :  { %1733 = dma.vmem_to_hbm [thread:$0]  %s1728_s30, 256, %s2882_s7, [#allocation3], %s2476_s14, %s2476_s14, %s2477_s15  }
 0x578   :  { %2467 = dma.done.wait [#allocation3], 256  }
 0x579   :  { %2468 = vsyncadd [#allocation3], 4294967040 }
 0x57a   :  { %1737 = vsyncpa [#allocation3], 1 }

</bundles_post_ra>
